<compile_context>
chip_gen: v6e
topology: v6e:2x2x1
jax: 0.10.0
libtpu: 0.0.40
codegen_flags: <defaults>
</compile_context>

<pallas_src>
import jax
import jax.numpy as jnp
from jax.experimental import pallas as pl
from jax.experimental.pallas import tpu as pltpu


_SQRT_2_OVER_PI = 0.7978845608028654  # sqrt(2/pi)
_GELU_COEFF = 0.044715


def _gelu_tanh_f32(h):
    # 0.5*h*(1 + tanh(c*(h + 0.044715*h^3))) with h^3 folded as h*(1+k*h^2),
    # fused so only one extra (TM, TH) f32 temporary stays live.
    t = jnp.tanh(_SQRT_2_OVER_PI * h * (1.0 + _GELU_COEFF * (h * h)))
    hh = 0.5 * h
    return hh + hh * t


def ffn_resident_kernel(x_ref, w1_ref, b1_ref, w2_ref, b2_ref, o_ref):
    # Whole W1/W2 are VMEM-resident (index_map constant in m).  Single H
    # step -> no accumulator scratch; write f32 result (+b2) straight out.
    h = jnp.dot(x_ref[...], w1_ref[...], preferred_element_type=jnp.float32)
    h = h + b1_ref[...].astype(jnp.float32)
    g = _gelu_tanh_f32(h)
    out = jnp.dot(g.astype(w2_ref.dtype), w2_ref[...],
                  preferred_element_type=jnp.float32)
    o_ref[...] = (out + b2_ref[...].astype(jnp.float32)).astype(o_ref.dtype)


def ffn_streamed_kernel(x_ref, w1_ref, b1_ref, w2_ref, b2_ref, o_ref, acc_ref):
    # x tile resident across the H (reduction) axis; weight tiles stream.
    h_idx = pl.program_id(1)

    @pl.when(h_idx == 0)
    def _():
        acc_ref[...] = jnp.zeros_like(acc_ref)

    # First linear, partial over the hidden dim: (TM, E) @ (E, TH) + b1 tile.
    h = jnp.dot(x_ref[...], w1_ref[...], preferred_element_type=jnp.float32)
    h = h + b1_ref[...].astype(jnp.float32)
    g = _gelu_tanh_f32(h)

    # Second linear partial sum, accumulated in the f32 VMEM scratch.  Cast g
    # back to the weight dtype so bf16 weights hit the fast MXU path.
    acc_ref[...] += jnp.dot(g.astype(w2_ref.dtype), w2_ref[...],
                            preferred_element_type=jnp.float32)

    # Finalize: add the output bias exactly once, write the tile once.
    @pl.when(h_idx == pl.num_programs(1) - 1)
    def _():
        o_ref[...] = (acc_ref[...] + b2_ref[...].astype(jnp.float32)
                      ).astype(o_ref.dtype)


def _round_up(x, m):
    return (x + m - 1) // m * m


def _vmem_capacity_bytes():
    """Physical VMEM of the current chip; conservative fallback if unknown."""
    try:
        info = pltpu.get_tpu_info()
        cap = getattr(info, "vmem_capacity_bytes", None)
        if cap:
            return int(cap)
    except Exception:
        pass
    return 64 * 1024 * 1024  # v7x per-TC size; safe lower bound elsewhere


def _resident_tm(M, E, H, dtype_bytes, budget):
    """Largest TM for the resident-weights plan, or None if weights don't fit.

    Conservative estimate: counts 2x buffering on every operand plus two f32
    copies of the (TM, H) GELU intermediate.
    """
    weight_bytes = 2 * (E * H + H * E + H + E) * dtype_bytes
    if weight_bytes > budget:
        return None
    tm = min(512, _round_up(M, 8))
    while True:
        act_bytes = 4 * tm * E * dtype_bytes   # x + out tiles, double-buffered
        inter_bytes = 2 * tm * H * 4           # GELU intermediates (f32)
        if weight_bytes + act_bytes + inter_bytes <= budget:
            return tm
        if tm <= 8:
            return None
        tm = max(8, (tm // 2) // 8 * 8)


def _streamed_tiles(M, E, H, dtype_bytes, budget, big_vmem):
    """Generation-aware TM/TH for the streamed-weights plan.

    128-MiB chips (v5e/v6e): large TM (weight-stream roofline on v6e needs
    ~680 flops/byte) and long TH slabs for DMA contiguity / fewer H steps.
    64-MiB chips (v7x): break-even ~310 flops/byte, so TM~512 / TH~256.
    """
    tm = min(1024 if big_vmem else 512, _round_up(M, 8))
    th = min(1024 if big_vmem else 256, _round_up(H, 128))

    def usage(tm_, th_):
        return (4 * tm_ * E * dtype_bytes        # x + out (double-buffered)
                + tm_ * E * 4                    # f32 accumulator scratch
                + 4 * th_ * E * dtype_bytes      # w1 + w2 tiles (double-buffered)
                + 2 * (th_ + E) * dtype_bytes)   # bias tiles

    while usage(tm, th) > budget and th > 128:
        th = max(128, (th // 2) // 128 * 128)
    while usage(tm, th) > budget and tm > 8:
        tm = max(8, (tm // 2) // 8 * 8)
    return tm, th


def feed_forward(x, w1, b1, w2, b2, *, force_streamed=False,
                 tm_override=None, th_override=None):
    """x: (B, S, E); w1: (E, H); b1: (H,); w2: (H, E); b2: (E,)  (H = 4*E).

    Weights are (in_features, out_features) == PyTorch Linear's W.T, so this
    computes GELU_tanh(x @ w1 + b1) @ w2 + b2.
    """
    B, S, E = x.shape
    H = w1.shape[1]
    M = B * S
    dtype_bytes = jnp.dtype(x.dtype).itemsize

    vmem = _vmem_capacity_bytes()
    big_vmem = vmem >= 100 * 1024 * 1024
    budget = int(vmem * 0.70)       # tile-selection budget
    vmem_limit = int(vmem * 0.85)   # scoped-VMEM limit with headroom

    x2d = x.reshape(M, E)
    b1_2d = b1.reshape(1, H)
    b2_2d = b2.reshape(1, E)

    tm_res = None if force_streamed else _resident_tm(M, E, H, dtype_bytes, budget)

    if tm_res is not None:
        # ---------------- Resident-weights plan ----------------
        TM = tm_override if tm_override else tm_res
        M_pad = _round_up(M, TM)
        if tm_override is None and M_pad // TM < 2 and TM >= 16 and M > 8:
            # Give both TensorCores on v7x independent M tiles to work on.
            TM = _round_up(TM // 2, 8)
            M_pad = _round_up(M, TM)
        if M_pad != M:
            x2d = jnp.pad(x2d, ((0, M_pad - M), (0, 0)))

        out2d = pl.pallas_call(
            ffn_resident_kernel,
            out_shape=jax.ShapeDtypeStruct((M_pad, E), x.dtype),
            grid_spec=pltpu.PrefetchScalarGridSpec(
                num_scalar_prefetch=0,
                grid=(M_pad // TM,),
                in_specs=[
                    pl.BlockSpec((TM, E), lambda m: (m, 0)),
                    # Full weights; index_map constant in m -> DMA'd once and
                    # re-used for every M tile.
                    pl.BlockSpec((E, H), lambda m: (0, 0)),
                    pl.BlockSpec((1, H), lambda m: (0, 0)),
                    pl.BlockSpec((H, E), lambda m: (0, 0)),
                    pl.BlockSpec((1, E), lambda m: (0, 0)),
                ],
                out_specs=pl.BlockSpec((TM, E), lambda m: (m, 0)),
            ),
            compiler_params=pltpu.CompilerParams(
                dimension_semantics=("parallel",),
                vmem_limit_bytes=vmem_limit,
            ),
        )(x2d, w1, b1_2d, w2, b2_2d)
    else:
        # ---------------- Streamed-weights plan ----------------
        TM, TH = _streamed_tiles(M, E, H, dtype_bytes, budget, big_vmem)
        if tm_override:
            TM = tm_override
        if th_override:
            TH = th_override
        M_pad = _round_up(M, TM)
        H_pad = _round_up(H, TH)
        if M_pad != M:
            x2d = jnp.pad(x2d, ((0, M_pad - M), (0, 0)))
        if H_pad != H:
            # Zero-padding the hidden dim is exact: GELU(0) == 0 and the
            # padded w2 rows are zero.
            w1 = jnp.pad(w1, ((0, 0), (0, H_pad - H)))
            b1_2d = jnp.pad(b1_2d, ((0, 0), (0, H_pad - H)))
            w2 = jnp.pad(w2, ((0, H_pad - H), (0, 0)))

        out2d = pl.pallas_call(
            ffn_streamed_kernel,
            out_shape=jax.ShapeDtypeStruct((M_pad, E), x.dtype),
            grid_spec=pltpu.PrefetchScalarGridSpec(
                num_scalar_prefetch=0,
                grid=(M_pad // TM, H_pad // TH),
                in_specs=[
                    # x tile resident across the H (reduction) axis.
                    pl.BlockSpec((TM, E), lambda m, h: (m, 0)),
                    # Weight / bias tiles stream along H.
                    pl.BlockSpec((E, TH), lambda m, h: (0, h)),
                    pl.BlockSpec((1, TH), lambda m, h: (0, h)),
                    pl.BlockSpec((TH, E), lambda m, h: (h, 0)),
                    pl.BlockSpec((1, E), lambda m, h: (0, 0)),
                ],
                out_specs=pl.BlockSpec((TM, E), lambda m, h: (m, 0)),
                scratch_shapes=[pltpu.VMEM((TM, E), jnp.float32)],
            ),
            compiler_params=pltpu.CompilerParams(
                dimension_semantics=("parallel", "arbitrary"),
                vmem_limit_bytes=vmem_limit,
            ),
        )(x2d, w1, b1_2d, w2, b2_2d)

    if M_pad != M:
        out2d = out2d[:M]
    return out2d.reshape(B, S, E)


def reference_feed_forward(x, w1, b1, w2, b2):
    h = jnp.einsum("bse,eh->bsh", x, w1) + b1
    c = jnp.sqrt(2.0 / jnp.pi)
    g = 0.5 * h * (1.0 + jnp.tanh(c * (h + 0.044715 * h ** 3)))
    return jnp.einsum("bsh,he->bse", g, w2) + b2


if __name__ == "__main__":
    # Small config consistent with the module: emb_dim=32 -> hidden=4*32=128.
    B, S, E = 2, 8, 32
    H = 4 * E

    key = jax.random.PRNGKey(0)
    kx, kw1, kb1, kw2, kb2 = jax.random.split(key, 5)

    x = jax.random.normal(kx, (B, S, E), dtype=jnp.float32)

    # Deterministic PyTorch-Linear-style uniform init (kaiming-uniform bounds).
    bound1 = 1.0 / jnp.sqrt(E)
    w1 = jax.random.uniform(kw1, (E, H), minval=-bound1, maxval=bound1, dtype=jnp.float32)
    b1 = jax.random.uniform(kb1, (H,), minval=-bound1, maxval=bound1, dtype=jnp.float32)
    bound2 = 1.0 / jnp.sqrt(H)
    w2 = jax.random.uniform(kw2, (H, E), minval=-bound2, maxval=bound2, dtype=jnp.float32)
    b2 = jax.random.uniform(kb2, (E,), minval=-bound2, maxval=bound2, dtype=jnp.float32)

    ref = reference_feed_forward(x, w1, b1, w2, b2)

    # 1) Resident-weights plan (the common case at this size).
    out = jax.block_until_ready(feed_forward(x, w1, b1, w2, b2))
    assert out.shape == (B, S, E)
    assert jnp.allclose(out, ref, atol=1e-5, rtol=1e-5), "resident plan mismatch"

    # 2) Streamed-weights plan, forced with a wider hidden dim so the H
    #    reduction has several steps (exercises the f32 accumulator path).
    H2 = 512
    kw1b, kb1b, kw2b, kb2b = jax.random.split(jax.random.PRNGKey(1), 4)
    w1b = jax.random.uniform(kw1b, (E, H2), minval=-bound1, maxval=bound1, dtype=jnp.float32)
    b1b = jax.random.uniform(kb1b, (H2,), minval=-bound1, maxval=bound1, dtype=jnp.float32)
    bound2b = 1.0 / jnp.sqrt(H2)
    w2b = jax.random.uniform(kw2b, (H2, E), minval=-bound2b, maxval=bound2b, dtype=jnp.float32)
    b2b = jax.random.uniform(kb2b, (E,), minval=-bound2b, maxval=bound2b, dtype=jnp.float32)
    out_s = jax.block_until_ready(
        feed_forward(x, w1b, b1b, w2b, b2b, force_streamed=True, th_override=128))
    ref_s = reference_feed_forward(x, w1b, b1b, w2b, b2b)
    assert jnp.allclose(out_s, ref_s, atol=1e-5, rtol=1e-5), "streamed plan mismatch"

    # 3) Ragged token count: exercises the pad-to-tile + output-slice path.
    x_r = x[:, :5, :]
    out_r = jax.block_until_ready(feed_forward(x_r, w1, b1, w2, b2))
    ref_r = reference_feed_forward(x_r, w1, b1, w2, b2)
    assert out_r.shape == (B, 5, E)
    assert jnp.allclose(out_r, ref_r, atol=1e-5, rtol=1e-5), "padded-M mismatch"

    print("KERNEL_OK")
</pallas_src>

<mosaic_0001>
module attributes {stable_mosaic.version = 11 : i64} {
  func.func @ffn_resident_kernel(%arg0: i32, %arg1: memref<8x32xf32, #tpu.memory_space<vmem>>, %arg2: memref<32x128xf32, #tpu.memory_space<vmem>>, %arg3: memref<1x128xf32, #tpu.memory_space<vmem>>, %arg4: memref<128x32xf32, #tpu.memory_space<vmem>>, %arg5: memref<1x32xf32, #tpu.memory_space<vmem>>, %arg6: memref<8x32xf32, #tpu.memory_space<vmem>>) attributes {dimension_semantics = [#tpu.dimension_semantics<parallel>], iteration_bounds = array<i64: 2>, scalar_prefetch = 0 : i64, scratch_operands = 0 : i64, tpu.core_type = #tpu.core_type<tc>, window_params = [{transform_indices = @transform_0, window_bounds = array<i64: 8, 32>}, {pipeline_mode = #tpu.pipeline_mode<synchronous>, transform_indices = @transform_1, window_bounds = array<i64: 32, 128>}, {pipeline_mode = #tpu.pipeline_mode<synchronous>, transform_indices = @transform_2, window_bounds = array<i64: 1, 128>}, {pipeline_mode = #tpu.pipeline_mode<synchronous>, transform_indices = @transform_3, window_bounds = array<i64: 128, 32>}, {pipeline_mode = #tpu.pipeline_mode<synchronous>, transform_indices = @transform_4, window_bounds = array<i64: 1, 32>}, {transform_indices = @transform_5, window_bounds = array<i64: 8, 32>}]} {
    %c0 = arith.constant 0 : index
    %c0_0 = arith.constant 0 : index
    %0 = vector.load %arg1[%c0, %c0_0] : memref<8x32xf32, #tpu.memory_space<vmem>>, vector<8x32xf32>
    %c0_1 = arith.constant 0 : index
    %c0_2 = arith.constant 0 : index
    %1 = vector.load %arg2[%c0_1, %c0_2] : memref<32x128xf32, #tpu.memory_space<vmem>>, vector<32x128xf32>
    %cst = arith.constant dense<0.000000e+00> : vector<8x128xf32>
    %2 = tpu.matmul %0, %1, %cst {dimension_numbers = #tpu.dot_dimension_numbers<[1], [0], [0], [1], [0, 0, 1, 1], [], []>} : vector<8x32xf32>, vector<32x128xf32>, vector<8x128xf32> -> vector<8x128xf32>
    %c0_3 = arith.constant 0 : index
    %c0_4 = arith.constant 0 : index
    %3 = vector.load %arg3[%c0_3, %c0_4] : memref<1x128xf32, #tpu.memory_space<vmem>>, vector<1x128xf32>
    %4 = vector.broadcast %3 : vector<1x128xf32> to vector<8x128xf32>
    %5 = arith.addf %2, %4 : vector<8x128xf32>
    %cst_5 = arith.constant 0.797884583 : f32
    %6 = vector.broadcast %cst_5 : f32 to vector<8x128xf32>
    %7 = arith.mulf %6, %5 : vector<8x128xf32>
    %8 = arith.mulf %5, %5 : vector<8x128xf32>
    %cst_6 = arith.constant 4.471500e-02 : f32
    %9 = vector.broadcast %cst_6 : f32 to vector<8x128xf32>
    %10 = arith.mulf %9, %8 : vector<8x128xf32>
    %cst_7 = arith.constant 1.000000e+00 : f32
    %11 = vector.broadcast %cst_7 : f32 to vector<8x128xf32>
    %12 = arith.addf %11, %10 : vector<8x128xf32>
    %13 = arith.mulf %7, %12 : vector<8x128xf32>
    %14 = math.tanh %13 : vector<8x128xf32>
    %cst_8 = arith.constant 5.000000e-01 : f32
    %15 = vector.broadcast %cst_8 : f32 to vector<8x128xf32>
    %16 = arith.mulf %15, %5 : vector<8x128xf32>
    %17 = arith.mulf %16, %14 : vector<8x128xf32>
    %18 = arith.addf %16, %17 : vector<8x128xf32>
    %c0_9 = arith.constant 0 : index
    %c0_10 = arith.constant 0 : index
    %19 = vector.load %arg4[%c0_9, %c0_10] : memref<128x32xf32, #tpu.memory_space<vmem>>, vector<128x32xf32>
    %cst_11 = arith.constant dense<0.000000e+00> : vector<8x32xf32>
    %20 = tpu.matmul %18, %19, %cst_11 {dimension_numbers = #tpu.dot_dimension_numbers<[1], [0], [0], [1], [0, 0, 1, 1], [], []>} : vector<8x128xf32>, vector<128x32xf32>, vector<8x32xf32> -> vector<8x32xf32>
    %c0_12 = arith.constant 0 : index
    %c0_13 = arith.constant 0 : index
    %21 = vector.load %arg5[%c0_12, %c0_13] : memref<1x32xf32, #tpu.memory_space<vmem>>, vector<1x32xf32>
    %22 = vector.broadcast %21 : vector<1x32xf32> to vector<8x32xf32>
    %23 = arith.addf %20, %22 : vector<8x32xf32>
    %c0_14 = arith.constant 0 : index
    %c0_15 = arith.constant 0 : index
    %24 = vector.load %arg6[%c0_14, %c0_15] : memref<8x32xf32, #tpu.memory_space<vmem>>, vector<8x32xf32>
    tpu.vector_store %arg6[%c0_14, %c0_15], %23 {strides = array<i32>} : memref<8x32xf32, #tpu.memory_space<vmem>>, vector<8x32xf32>,
    return
  }
  func.func @transform_0(%arg0: i32) -> (i32, i32) {
    %c0_i32 = arith.constant 0 : i32
    %c0_i32_0 = arith.constant 0 : i32
    return %arg0, %c0_i32 : i32, i32
  }
  func.func @transform_1(%arg0: i32) -> (i32, i32) {
    %c0_i32 = arith.constant 0 : i32
    %c0_i32_0 = arith.constant 0 : i32
    %c0_i32_1 = arith.constant 0 : i32
    return %c0_i32, %c0_i32_0 : i32, i32
  }
  func.func @transform_2(%arg0: i32) -> (i32, i32) {
    %c0_i32 = arith.constant 0 : i32
    %c0_i32_0 = arith.constant 0 : i32
    %c0_i32_1 = arith.constant 0 : i32
    return %c0_i32, %c0_i32_0 : i32, i32
  }
  func.func @transform_3(%arg0: i32) -> (i32, i32) {
    %c0_i32 = arith.constant 0 : i32
    %c0_i32_0 = arith.constant 0 : i32
    %c0_i32_1 = arith.constant 0 : i32
    return %c0_i32, %c0_i32_0 : i32, i32
  }
  func.func @transform_4(%arg0: i32) -> (i32, i32) {
    %c0_i32 = arith.constant 0 : i32
    %c0_i32_0 = arith.constant 0 : i32
    %c0_i32_1 = arith.constant 0 : i32
    return %c0_i32, %c0_i32_0 : i32, i32
  }
  func.func @transform_5(%arg0: i32) -> (i32, i32) {
    %c0_i32 = arith.constant 0 : i32
    %c0_i32_0 = arith.constant 0 : i32
    return %arg0, %c0_i32 : i32, i32
  }
}

</mosaic_0001>

<bundles_post_ra>
// kernel: tpu_custom_call.1
= control target key start
LH: loop header
LB: loop body
LE: loop exit
PB: predicated region body
PF: predicated region fallthrough
CT: control target
= control target key end

     0   :  { %10 = vsyncpa [#allocation3], 0  ;;  %s884_s0 = inlined_call_operand.vmem [shape: f32[16,32], index: 0, kind: input, shape index: {}]   ;;  %s885_s1 = inlined_call_operand.vmem [shape: f32[32,128], index: 1, kind: input, shape index: {}]   ;;  %s886_s2 = inlined_call_operand.vmem [shape: f32[1,128], index: 2, kind: input, shape index: {}]   ;;  %s887_s3 = inlined_call_operand.vmem [shape: f32[128,32], index: 3, kind: input, shape index: {}]   ;;  %s888_s4 = inlined_call_operand.vmem [shape: f32[1,32], index: 4, kind: input, shape index: {}]   ;;  %s889_s5 = inlined_call_operand.hbm [shape: f32[16,32], index: 5, kind: output, shape index: {}]  }
   0x1   :  { %12 = vsyncpa [#allocation3 + $0x1], 0  ;;  %s701_s18 = smov 0   ;;  %s703_s19 = smov 0  }
   0x2   :  { %s705_s20 = smov 0   ;;  %s707_s21 = smov 0  }
   0x3 LB: > { %s722_s22 = sadd.s32 4294967295, %s666_s21   ;;  %s482_s23 = sadd.s32 4294967294, %s666_s21   ;;  %s666_s21 = sphi %s707_s21, %s895_s21   ;;  %s662_s20 = sphi %s705_s20, %s894_s20   ;;  %s658_s19 = sphi %s703_s19, %s893_s19   ;;  %s654_s18 = sphi %s701_s18, %s892_s18  }
   0x4   : > { %s726_s24 = sadd.s32 1, %s666_s21   ;;  %s135_s25 = sadd.s32 1, %s662_s20 }
   0x5   : > { %s132_s26 = ssub.s32 %s666_s21, %s726_s24  ;;  %p145_p0 = scmp.ne.s32.totalorder %s662_s20, %s658_s19 }
   0x6   : > { %p133_p1 = scmp.eq.s32.totalorder %s132_s26, 0  ;;  %p146_p2 = scmp.eq.s32.totalorder %s722_s22, 1 }
   0x7   : > { %p151_p3 = scmp.ne.s32.totalorder %s658_s19, %s654_s18  ;;  %p152_p4 = scmp.eq.s32.totalorder %s482_s23, 1 }
   0x8   : > { %s737_s27 = scalar_select %p133_p1, %s662_s20, %s135_s25  }
   0x9   : > { %p739_p5 = por %p146_p2, %p145_p0  ;;  %p743_p6 = por %p152_p4, %p151_p3 }
   0xa   : > { %p485_p7 = scmp.ge.s32.totalorder %s666_s21, 1  ;;  %p189_p8 = scmp.lt.s32.totalorder %s666_s21, 3 }
   0xc   : > { %p190_p9 = pnand %p485_p7, %p189_p8 }
   0xd   : > { %p216_p10 = scmp.lt.s32.totalorder (!%p190_p9), %s722_s22, 1  ;;  %s213_s26 = sand.u32 (!%p190_p9), 1, %s658_s19  }
   0xe   : > { %193 = sbr.rel (%p190_p9) target bundleno = 457 (0x1c9), region = 40  ;;  %s486_s30 = sshll.u32 (!%p190_p9), %s213_s26, 3 }
   0xf   : > { %s492_s8 = sshll.u32 (!%p190_p9), %s722_s22, 7  ;;  %s215_s9 = scalar_lea.vmem (!%p190_p9), [#allocation2], %s486_s30 }
  0x10   : > { %s423_s10 = sshll.u32 (!%p190_p9), %s215_s9, 4  ;;  %s848_s13 = scalar_lea.hbm (!%p190_p9), %s889_s5, %s492_s8  ;;  %s424_s10 = int_to_ptr.vmem [resolvable:$true] %s423_s10 }
  0x11   : > { %s606_s15 = scalar_lea.vmem (!%p190_p9), %s424_s10, 128 }
  0x12   : > { %p607_p11 = scmp.ne.s32.totalorder (!%p190_p9), %s424_s10, %s606_s15 }
  0x13   : > { %v224_v0 = vld [vmem:[%s885_s1 + $0x18] sm:$0xff]  ;;  %v668_v1 = vmov 0.0   ;;  %v223_v2 = vld [vmem:[%s885_s1 + $0x10] sm:$0xff]  ;;  %vm669_vm0 = vmmov 0   ;;  %s217_s11 = scalar_select %p216_p10, %s722_s22, 1  ;;  %v222_v4 = vld [vmem:[%s885_s1 + $0x8] sm:$0xff] }
  0x14   : > { %517 = vmatprep.subr.mxu0 %v668_v1  ;;  %525 = vmatprep.mubr.msk.f32.mxu0 %vm669_vm0, %v668_v1  ;;  %v330_v3 = vld [vmem:[%s887_s3 + $0x78] sm:$0xff]  ;;  %v221_v5 = vld [vmem:[%s885_s1] sm:$0xff]  ;;  %vm232_vm1 = vcmask 261120   ;;  %v329_v7 = vld [vmem:[%s887_s3 + $0x70] sm:$0xff]  ;;  %p608_p12 = pnand %p607_p11, %p739_p5  ;;  %s670_s22 = smov [#allocation2]  }
  0x15   : > { %518 = vmatpush3.msra.mxu0 %v224_v0  ;;  %528 = vmatprep.subr.mxu1 %v668_v1  ;;  %s487_s14 = sshll.u32 %s217_s11, 3  ;;  %v328_v8 = vld [vmem:[%s887_s3 + $0x68] sm:$0xff]  ;;  %v327_v9 = vld [vmem:[%s887_s3 + $0x60] sm:$0xff]  ;;  %v326_v10 = vld [vmem:[%s887_s3 + $0x58] sm:$0xff]  ;;  %s610_s16 = sshll.u32 %s670_s22, 4  ;;  %s611_s16 = int_to_ptr.vmem [resolvable:$false] %s610_s16 }
  0x16   : > { %519 = vmatprep.subr.mxu0 %v668_v1  ;;  %529 = vmatpush3.msra.mxu1 %v330_v3  ;;  %s219_s25 = scalar_lea.vmem %s884_s0, %s487_s14  ;;  %v325_v11 = vld [vmem:[%s887_s3 + $0x50] sm:$0xff]  ;;  %v324_v12 = vld [vmem:[%s887_s3 + $0x48] sm:$0xff]  ;;  %v323_v13 = vld [vmem:[%s887_s3 + $0x40] sm:$0xff]  ;;  %s410_s14 = scalar_lea.sflag [#allocation3], %s213_s26 }
  0x17   : > { %520 = vmatpush3.msra.mxu0 %v223_v2  ;;  %530 = vmatprep.subr.mxu1 %v668_v1  ;;  %v220_v6 = vld [vmem:[%s219_s25] sm:$0xff]  ;;  %v322_v14 = vld [vmem:[%s887_s3 + $0x38] sm:$0xff]  ;;  %v321_v15 = vld [vmem:[%s887_s3 + $0x30] sm:$0xff]  ;;  %p609_p13 = pneg %p608_p12  ;;  %s612_s17 = scalar_lea.vmem %s611_s16, 256 }
  0x18   : > { %521 = vmatprep.subr.mxu0 %v668_v1  ;;  %560 = vmatprep.mubr.msk.f32.mxu1 %vm669_vm0, %v668_v1  ;;  %v320_v16 = vld [vmem:[%s887_s3 + $0x28] sm:$0xff]  ;;  %v319_v17 = vld [vmem:[%s887_s3 + $0x20] sm:$0xff]  ;;  %v318_v18 = vld [vmem:[%s887_s3 + $0x18] sm:$0xff]  ;;  %p613_p0 = scmp.lt.s32.totalorder %s424_s10, %s611_s16  ;;  %p614_p1 = scmp.lt.s32.totalorder %s612_s17, %s606_s15 }
  0x19   : > { %522 = vmatpush3.msra.mxu0 %v222_v4  ;;  %531 = vmatpush3.msra.mxu1 %v329_v7  ;;  %v317_v19 = vld [vmem:[%s887_s3 + $0x10] sm:$0xff]  ;;  %v316_v20 = vld [vmem:[%s887_s3 + $0x8] sm:$0xff]  ;;  %v315_v21 = vld [vmem:[%s887_s3] sm:$0xff] }
  0x1a   : > { %523 = vmatprep.subr.mxu0 %v668_v1  ;;  %532 = vmatprep.subr.mxu1 %v668_v1  ;;  %v488_v22 = vld [vmem:[%s886_s2] ss:$0 sm:$0xff]  ;;  %p615_p2 = por %p614_p1, %p613_p0 }
  0x1b   : > { %524 = vmatpush3.msra.mxu0 %v221_v5  ;;  %533 = vmatpush3.msra.mxu1 %v328_v8  ;;  %v490_v35 = vld [vmem:[%s888_s4] ss:$0 sm:$0xff] }
  0x1c   : > { %526 = vmatmul.mubr.msk.f32.vlgmr.msra.gmra.mxu0 %vm232_vm1, %v220_v6  ;;  %534 = vmatprep.subr.mxu1 %v668_v1  ;;  %p616_p3 = pnand %p615_p2, %p609_p13 }
  0x1d   : > { %535 = vmatpush3.msra.mxu1 %v327_v9 }
  0x1e   : > { %536 = vmatprep.subr.mxu1 %v668_v1 }
  0x1f   : > { %537 = vmatpush3.msra.mxu1 %v326_v10 }
  0x20   : > { %538 = vmatprep.subr.mxu1 %v668_v1 }
  0x21   : > { %539 = vmatpush3.msra.mxu1 %v325_v11 }
  0x22   : > { %540 = vmatprep.subr.mxu1 %v668_v1 }
  0x23   : > { %541 = vmatpush3.msra.mxu1 %v324_v12 }
  0x24   : > { %542 = vmatprep.subr.mxu1 %v668_v1 }
  0x25   : > { %543 = vmatpush3.msra.mxu1 %v323_v13 }
  0x26   : > { %544 = vmatprep.subr.mxu1 %v668_v1 }
  0x27   : > { %545 = vmatpush3.msra.mxu1 %v322_v14 }
  0x28   : > { %546 = vmatprep.subr.mxu1 %v668_v1 }
  0x29   : > { %547 = vmatpush3.msra.mxu1 %v321_v15 }
  0x2a   : > { %548 = vmatprep.subr.mxu1 %v668_v1 }
  0x2b   : > { %549 = vmatpush3.msra.mxu1 %v320_v16 }
  0x2c   : > { %550 = vmatprep.subr.mxu1 %v668_v1 }
  0x2d   : > { %551 = vmatpush3.msra.mxu1 %v319_v17 }
  0x2e   : > { %552 = vmatprep.subr.mxu1 %v668_v1 }
  0x2f   : > { %553 = vmatpush3.msra.mxu1 %v318_v18 }
  0x30   : > { %554 = vmatprep.subr.mxu1 %v668_v1 }
  0x31   : > { %555 = vmatpush3.msra.mxu1 %v317_v19 }
  0x32   : > { %556 = vmatprep.subr.mxu1 %v668_v1 }
  0x33   : > { %557 = vmatpush3.msra.mxu1 %v316_v20 }
  0x34   : > { %558 = vmatprep.subr.mxu1 %v668_v1 }
  0x35   : > { %559 = vmatpush3.msra.mxu1 %v315_v21 }
  0xdc   : > { %v302_v23 = vpop.f32.mrf.mxu0 }
  0xdd   : > { %v303_v24 = vadd.f32 %v488_v22, %v302_v23 }
  0xde   : > { %v527_v25 = vpop.f32.mrf.mxu0 }
  0xdf   : > { %v307_v26 = vmul.f32 %v303_v24, %v303_v24  ;;  %v306_v28 = vmul.f32 0.7978846, %v303_v24  ;;  %v312_v31 = vmul.f32 0.5, %v303_v24 }
  0xe1   : > { %v308_v27 = vmul.f32 0.044715, %v307_v26 }
  0xe3   : > { %v309_v29 = vadd.f32 1.0, %v308_v27 }
  0xe5   : > { %v310_v30 = vmul.f32 %v309_v29, %v306_v28 }
  0xe7   : > { %604 = vtanh.f32 %v310_v30 }
  0xf4   : > { %v605_v32 = vpop.eup %604 }
  0xf5   : > { %v313_v33 = vmul.f32 %v605_v32, %v312_v31 }
  0xf7   : > { %v314_v34 = vadd.f32 %v313_v33, %v312_v31 }
  0xf9   : > { %561 = vmatmul.mubr.f32.vlgmr.msra.gmra.mxu1 %v314_v34 }
 0x1b9   : > { %v404_v36 = vpop.f32.mrf.mxu1 }
 0x1ba   : > { %v405_v37 = vadd.f32 %v490_v35, %v404_v36 }
 0x1bb   : > { %v562_v38 = vpop.f32.mrf.mxu1 }
 0x1bc   : > { %408 = vst.msk [vmem:[%s215_s9] sm:$0xff] %vm232_vm1, %v405_v37 }
 0x1bd   : > { %619 = shalt.err (!%p616_p3)
}
 0x1be   : > { %s620_s23 = scalar_lea.hbm %s848_s13, 128  ;;  %s624_s30 = scalar_lea.hbm %s889_s5, 256 }
 0x1bf   : > { %p621_p4 = scmp.ne.s32.totalorder %s848_s13, %s620_s23  ;;  %p625_p9 = scmp.lt.s32.totalorder %s848_s13, %s889_s5 }
 0x1c0   : > { %p626_p10 = scmp.lt.s32.totalorder %s624_s30, %s620_s23 }
 0x1c1   : > { %p622_p7 = pnand %p621_p4, %p739_p5 }
 0x1c2   : > { %p627_p11 = por %p626_p10, %p625_p9 }
 0x1c3   : > { %p623_p8 = pneg %p622_p7 }
 0x1c5   : > { %p628_p12 = pnand %p627_p11, %p623_p8 }
 0x1c7   : > { %631 = shalt.err (!%p628_p12)
}
 0x1c8   : > { %563 = dma.vmem_to_hbm [thread:$0]  (%p739_p5), %s424_s10, 128, %s848_s13, %s410_s14  }
 0x1c9 PF: > { %p569_p13 = scmp.ge.s32.totalorder %s666_s21, 2  ;;  %s435_s8 = sand.u32 1, %s654_s18  }
 0x1ca   : > { %s436_s9 = scalar_lea.sflag [#allocation3], %s435_s8 }
 0x1cb   : > { %p566_p0 = pnand %p569_p13, %p743_p6 }
 0x1cd   : > { %p567_p1 = pneg %p566_p0 }
 0x1cf   : > { %649 = dma.done.wait (%p567_p1), %s436_s9, 128  }
 0x1d0   : > { %651 = vsyncadd (%p567_p1), %s436_s9, 4294967168  ;;  %p15_p2 = scmp.ge.s32.totalorder %s726_s24, 4   ;;  %s892_s18 = smov %s658_s19 }
 0x1d1   : > { %s893_s19 = smov %s662_s20  ;;  %s894_s20 = smov %s737_s27 }
 0x1d2   : > { %s895_s21 = smov %s726_s24  ;;  %17 = sbr.rel (!%p15_p2) target bundleno = 3 (0x3), region = 75 }
 0x1d7   :  { %441 = vsyncpa [#allocation3], 1 }
 0x1d8   :  { %443 = vsyncpa [#allocation3 + $0x1], 1 }

</bundles_post_ra>
